<compile_context>
chip_gen: v7x
topology: tpu7x:2x2x1
jax: 0.10.0
libtpu: 0.0.40
codegen_flags: <defaults>
</compile_context>

<pallas_src>
import functools

import jax
import jax.numpy as jnp
from jax.experimental import pallas as pl
from jax.experimental.pallas import tpu as pltpu

_LANES = 128


def _round_up(x, m):
    return ((x + m - 1) // m) * m


def _tensorcores_per_chip():
    """2 on v7x (dual TensorCore), 1 on v5e/v6e.  Safe fallback: 1."""
    try:
        kind = jax.devices()[0].device_kind.lower()
    except Exception:
        return 1
    return 2 if ("v7" in kind or "tpu7" in kind) else 1


def _physics_loss_kernel(pred_ref, targ_ref, hs_ref, energy_ref, out_ref,
                         acc_mse_ref, acc_phys_ref, *, mse_scale, phys_scale):
    """One grid step: elementwise accumulate; reduce once at the last step."""
    i = pl.program_id(1)            # accumulation step ("arbitrary")
    ni = pl.num_programs(1)

    @pl.when(i == 0)
    def _init():
        acc_mse_ref[...] = jnp.zeros_like(acc_mse_ref)
        acc_phys_ref[...] = jnp.zeros_like(acc_phys_ref)

    # MSE term: (pred - targ)^2 over a lane-dense (TM, 128) tile.
    d = pred_ref[...].astype(jnp.float32) - targ_ref[...].astype(jnp.float32)
    acc_mse_ref[...] += d * d

    # Physics term: (hs^2 / 16 - energy)^2 over a lane-dense (TP, 128) tile.
    hs = hs_ref[...].astype(jnp.float32)
    e = energy_ref[...].astype(jnp.float32)
    pe = hs * hs * (1.0 / 16.0) - e
    acc_phys_ref[...] += pe * pe

    @pl.when(i == ni - 1)
    def _finalize():
        total = (mse_scale * jnp.sum(acc_mse_ref[...])
                 + phys_scale * jnp.sum(acc_phys_ref[...]))
        # Lane-dense (8, 128) output block; the wrapper reads element
        # [c*8, 0] of each per-chunk block and sums them.
        out_ref[...] = jnp.broadcast_to(total, out_ref.shape).astype(jnp.float32)


def _reference_loss(prediction, target, input_features,
                    mse_weight=1.0, physics_weight=0.1):
    pred_last = prediction[:, -1, :].astype(jnp.float32)
    targ_last = target[:, -1, :].astype(jnp.float32)
    loss_mse = jnp.mean((pred_last - targ_last) ** 2)
    input_energy = input_features[:, -1, 0].astype(jnp.float32)
    predicted_hs = pred_last[:, 0]
    energy_from_hs = predicted_hs ** 2 / 16.0
    loss_physics = jnp.mean((energy_from_hs - input_energy) ** 2)
    return mse_weight * loss_mse + physics_weight * loss_physics


def physics_informed_loss(prediction, target, input_features,
                          mse_weight=1.0, physics_weight=0.1,
                          use_pallas=None, max_tile_rows=2048):
    """Pallas implementation of PhysicsInformedLoss.forward."""
    B, T, F = prediction.shape
    itemsize = jnp.dtype(prediction.dtype).itemsize

    if use_pallas is None:
        # Bytes-based threshold: only engage the kernel when the last-step
        # data can actually approach the HBM roofline.
        use_pallas = (2 * B * F * itemsize) >= (2 << 20)
    if not use_pallas:
        return _reference_loss(prediction, target, input_features,
                               mse_weight, physics_weight)

    # Last-time-step slices (tiny XLA strided copies; see TODO(synk) above).
    pred_last = prediction[:, -1, :]          # (B, F)
    targ_last = target[:, -1, :]              # (B, F)
    hs = prediction[:, -1, 0]                 # (B,)   predicted Hs
    energy = input_features[:, -1, 0]         # (B,)   input wave energy

    # ---- lane-dense slab / grid geometry (all static Python ints) --------
    rows_mse = pl.cdiv(B * F, _LANES)         # rows of the (rows,128) MSE slab
    rows_phys = pl.cdiv(B, _LANES)            # rows of the physics slab

    tm = min(int(max_tile_rows), _round_up(rows_mse, 8))
    n_tiles = pl.cdiv(rows_mse, tm)
    nc = 2 if (_tensorcores_per_chip() == 2 and n_tiles >= 2) else 1
    n_per_core = pl.cdiv(n_tiles, nc)
    n_steps = nc * n_per_core                 # total grid steps
    # Re-fit the tile height to the final step count to minimize padding.
    tm = _round_up(pl.cdiv(rows_mse, n_steps), 8)
    tp = _round_up(pl.cdiv(rows_phys, n_steps), 8)
    rows_mse_p = n_steps * tm
    rows_phys_p = n_steps * tp

    def slab(x, rows):
        flat = jnp.ravel(x)
        return jnp.pad(flat, (0, rows * _LANES - flat.size)).reshape(rows, _LANES)

    pred_slab = slab(pred_last, rows_mse_p)       # (rows_mse_p, 128)
    targ_slab = slab(targ_last, rows_mse_p)       # (rows_mse_p, 128)
    hs_slab = slab(hs, rows_phys_p)               # (rows_phys_p, 128)
    energy_slab = slab(energy, rows_phys_p)       # (rows_phys_p, 128)

    kernel = functools.partial(
        _physics_loss_kernel,
        mse_scale=float(mse_weight) / float(B * F),
        phys_scale=float(physics_weight) / float(B))

    def block_map(c, i, n=n_per_core):
        return (c * n + i, 0)

    bytes_accessed = ((2 * rows_mse_p + 2 * rows_phys_p) * _LANES * itemsize
                      + nc * 8 * _LANES * 4)

    partials = pl.pallas_call(
        kernel,
        out_shape=jax.ShapeDtypeStruct((nc * 8, _LANES), jnp.float32),
        grid_spec=pltpu.PrefetchScalarGridSpec(
            num_scalar_prefetch=0,
            grid=(nc, n_per_core),
            in_specs=[
                pl.BlockSpec((tm, _LANES), block_map),   # prediction slab
                pl.BlockSpec((tm, _LANES), block_map),   # target slab
                pl.BlockSpec((tp, _LANES), block_map),   # predicted-Hs slab
                pl.BlockSpec((tp, _LANES), block_map),   # input-energy slab
            ],
            out_specs=pl.BlockSpec((8, _LANES), lambda c, i: (c, 0)),
            scratch_shapes=[
                pltpu.VMEM((tm, _LANES), jnp.float32),   # MSE accumulator
                pltpu.VMEM((tp, _LANES), jnp.float32),   # physics accumulator
            ],
        ),
        compiler_params=pltpu.CompilerParams(
            dimension_semantics=("parallel", "arbitrary")),
        cost_estimate=pl.CostEstimate(
            flops=3 * B * F + 6 * B,
            transcendentals=0,
            bytes_accessed=int(bytes_accessed)),
    )(pred_slab, targ_slab, hs_slab, energy_slab)

    # One weighted partial per TensorCore chunk at row c*8, lane 0.
    return jnp.sum(partials[0::8, 0])


if __name__ == "__main__":
    key = jax.random.PRNGKey(0)
    k1, k2, k3, k4, k5, k6 = jax.random.split(key, 6)

    # Case 1: the module's nominal small shape (batch=2, seq=8, features=4).
    B, T, F = 2, 8, 4
    F_IN = 5
    prediction = jax.random.normal(k1, (B, T, F), dtype=jnp.float32)
    target = jax.random.normal(k2, (B, T, F), dtype=jnp.float32)
    input_features = jax.random.normal(k3, (B, T, F_IN), dtype=jnp.float32)

    loss = physics_informed_loss(prediction, target, input_features,
                                 mse_weight=1.0, physics_weight=0.1,
                                 use_pallas=True)   # force the kernel path
    loss = jax.block_until_ready(loss)
    ref = _reference_loss(prediction, target, input_features, 1.0, 0.1)
    assert jnp.allclose(loss, ref, rtol=1e-5, atol=1e-6), (loss, ref)

    # Case 2: larger batch with an artificially small tile cap to exercise
    # the multi-step accumulation path, the zero-padded ragged tail, and the
    # optional two-chunk split on dual-TensorCore chips.
    B2 = 300
    prediction2 = jax.random.normal(k4, (B2, T, F), dtype=jnp.float32)
    target2 = jax.random.normal(k5, (B2, T, F), dtype=jnp.float32)
    input_features2 = jax.random.normal(k6, (B2, T, F_IN), dtype=jnp.float32)

    loss2 = physics_informed_loss(prediction2, target2, input_features2,
                                  mse_weight=1.0, physics_weight=0.1,
                                  use_pallas=True, max_tile_rows=8)
    loss2 = jax.block_until_ready(loss2)
    ref2 = _reference_loss(prediction2, target2, input_features2, 1.0, 0.1)
    assert jnp.allclose(loss2, ref2, rtol=1e-5, atol=1e-6), (loss2, ref2)

    print("KERNEL_OK")
</pallas_src>

<mosaic_0001>
module attributes {stable_mosaic.version = 11 : i64} {
  func.func @_physics_loss_kernel(%arg0: i32, %arg1: i32, %arg2: memref<8x128xf32, #tpu.memory_space<vmem>>, %arg3: memref<8x128xf32, #tpu.memory_space<vmem>>, %arg4: memref<8x128xf32, #tpu.memory_space<vmem>>, %arg5: memref<8x128xf32, #tpu.memory_space<vmem>>, %arg6: memref<8x128xf32, #tpu.memory_space<vmem>>, %arg7: memref<8x128xf32, #tpu.memory_space<vmem>>, %arg8: memref<8x128xf32, #tpu.memory_space<vmem>>) attributes {dimension_semantics = [#tpu.dimension_semantics<parallel>, #tpu.dimension_semantics<arbitrary>], iteration_bounds = array<i64: 1, 1>, scalar_prefetch = 0 : i64, scratch_operands = 2 : i64, tpu.core_type = #tpu.core_type<tc>, window_params = [{transform_indices = @transform_0, window_bounds = array<i64: 8, 128>}, {transform_indices = @transform_1, window_bounds = array<i64: 8, 128>}, {transform_indices = @transform_2, window_bounds = array<i64: 8, 128>}, {transform_indices = @transform_3, window_bounds = array<i64: 8, 128>}, {transform_indices = @transform_4, window_bounds = array<i64: 8, 128>}]} {
    %c0_i32 = arith.constant 0 : i32
    %0 = arith.cmpi eq, %arg1, %c0_i32 : i32
    %1 = arith.extui %0 : i1 to i32
    %c0_i32_0 = arith.constant 0 : i32
    %2 = arith.cmpi ne, %1, %c0_i32_0 : i32
    scf.if %2 {
      %cst_18 = arith.constant 0.000000e+00 : f32
      %23 = vector.broadcast %cst_18 : f32 to vector<8x128xf32>
      %c0_19 = arith.constant 0 : index
      %c0_20 = arith.constant 0 : index
      %24 = vector.load %arg7[%c0_19, %c0_20] : memref<8x128xf32, #tpu.memory_space<vmem>>, vector<8x128xf32>
      tpu.vector_store %arg7[%c0_19, %c0_20], %23 {strides = array<i32>} : memref<8x128xf32, #tpu.memory_space<vmem>>, vector<8x128xf32>,
      %cst_21 = arith.constant 0.000000e+00 : f32
      %25 = vector.broadcast %cst_21 : f32 to vector<8x128xf32>
      %c0_22 = arith.constant 0 : index
      %c0_23 = arith.constant 0 : index
      %26 = vector.load %arg8[%c0_22, %c0_23] : memref<8x128xf32, #tpu.memory_space<vmem>>, vector<8x128xf32>
      tpu.vector_store %arg8[%c0_22, %c0_23], %25 {strides = array<i32>} : memref<8x128xf32, #tpu.memory_space<vmem>>, vector<8x128xf32>,
    } else {
    }
    %c0 = arith.constant 0 : index
    %c0_1 = arith.constant 0 : index
    %3 = vector.load %arg2[%c0, %c0_1] : memref<8x128xf32, #tpu.memory_space<vmem>>, vector<8x128xf32>
    %c0_2 = arith.constant 0 : index
    %c0_3 = arith.constant 0 : index
    %4 = vector.load %arg3[%c0_2, %c0_3] : memref<8x128xf32, #tpu.memory_space<vmem>>, vector<8x128xf32>
    %5 = arith.subf %3, %4 : vector<8x128xf32>
    %c0_4 = arith.constant 0 : index
    %c0_5 = arith.constant 0 : index
    %6 = vector.load %arg7[%c0_4, %c0_5] : memref<8x128xf32, #tpu.memory_space<vmem>>, vector<8x128xf32>
    %7 = arith.mulf %5, %5 : vector<8x128xf32>
    %8 = arith.addf %6, %7 : vector<8x128xf32>
    %c0_6 = arith.constant 0 : index
    %c0_7 = arith.constant 0 : index
    %9 = vector.load %arg7[%c0_6, %c0_7] : memref<8x128xf32, #tpu.memory_space<vmem>>, vector<8x128xf32>
    tpu.vector_store %arg7[%c0_6, %c0_7], %8 {strides = array<i32>} : memref<8x128xf32, #tpu.memory_space<vmem>>, vector<8x128xf32>,
    %c0_8 = arith.constant 0 : index
    %c0_9 = arith.constant 0 : index
    %10 = vector.load %arg4[%c0_8, %c0_9] : memref<8x128xf32, #tpu.memory_space<vmem>>, vector<8x128xf32>
    %c0_10 = arith.constant 0 : index
    %c0_11 = arith.constant 0 : index
    %11 = vector.load %arg5[%c0_10, %c0_11] : memref<8x128xf32, #tpu.memory_space<vmem>>, vector<8x128xf32>
    %12 = arith.mulf %10, %10 : vector<8x128xf32>
    %cst = arith.constant 6.250000e-02 : f32
    %13 = vector.broadcast %cst : f32 to vector<8x128xf32>
    %14 = arith.mulf %12, %13 : vector<8x128xf32>
    %15 = arith.subf %14, %11 : vector<8x128xf32>
    %c0_12 = arith.constant 0 : index
    %c0_13 = arith.constant 0 : index
    %16 = vector.load %arg8[%c0_12, %c0_13] : memref<8x128xf32, #tpu.memory_space<vmem>>, vector<8x128xf32>
    %17 = arith.mulf %15, %15 : vector<8x128xf32>
    %18 = arith.addf %16, %17 : vector<8x128xf32>
    %c0_14 = arith.constant 0 : index
    %c0_15 = arith.constant 0 : index
    %19 = vector.load %arg8[%c0_14, %c0_15] : memref<8x128xf32, #tpu.memory_space<vmem>>, vector<8x128xf32>
    tpu.vector_store %arg8[%c0_14, %c0_15], %18 {strides = array<i32>} : memref<8x128xf32, #tpu.memory_space<vmem>>, vector<8x128xf32>,
    %c0_i32_16 = arith.constant 0 : i32
    %20 = arith.cmpi eq, %arg1, %c0_i32_16 : i32
    %21 = arith.extui %20 : i1 to i32
    %c0_i32_17 = arith.constant 0 : i32
    %22 = arith.cmpi ne, %21, %c0_i32_17 : i32
    scf.if %22 {
      %c0_18 = arith.constant 0 : index
      %c0_19 = arith.constant 0 : index
      %23 = vector.load %arg7[%c0_18, %c0_19] : memref<8x128xf32, #tpu.memory_space<vmem>>, vector<8x128xf32>
      %24 = vector.shape_cast %23 : vector<8x128xf32> to vector<1x8x128xf32>
      %cst_20 = arith.constant dense<0.000000e+00> : vector<1xf32>
      %25 = vector.multi_reduction <add>, %24, %cst_20 [1, 2] : vector<1x8x128xf32> to vector<1xf32>
      %26 = vector.shape_cast %25 : vector<1xf32> to vector<1x1x1xf32>
      %27 = vector.extract %26[0, 0, 0] : f32 from vector<1x1x1xf32>
      %cst_21 = arith.constant 1.250000e-01 : f32
      %28 = arith.mulf %cst_21, %27 : f32
      %c0_22 = arith.constant 0 : index
      %c0_23 = arith.constant 0 : index
      %29 = vector.load %arg8[%c0_22, %c0_23] : memref<8x128xf32, #tpu.memory_space<vmem>>, vector<8x128xf32>
      %30 = vector.shape_cast %29 : vector<8x128xf32> to vector<1x8x128xf32>
      %cst_24 = arith.constant dense<0.000000e+00> : vector<1xf32>
      %31 = vector.multi_reduction <add>, %30, %cst_24 [1, 2] : vector<1x8x128xf32> to vector<1xf32>
      %32 = vector.shape_cast %31 : vector<1xf32> to vector<1x1x1xf32>
      %33 = vector.extract %32[0, 0, 0] : f32 from vector<1x1x1xf32>
      %cst_25 = arith.constant 5.000000e-02 : f32
      %34 = arith.mulf %cst_25, %33 : f32
      %35 = arith.addf %28, %34 : f32
      %36 = vector.broadcast %35 : f32 to vector<8x128xf32>
      %c0_26 = arith.constant 0 : index
      %c0_27 = arith.constant 0 : index
      %37 = vector.load %arg6[%c0_26, %c0_27] : memref<8x128xf32, #tpu.memory_space<vmem>>, vector<8x128xf32>
      tpu.vector_store %arg6[%c0_26, %c0_27], %36 {strides = array<i32>} : memref<8x128xf32, #tpu.memory_space<vmem>>, vector<8x128xf32>,
    } else {
    }
    return
  }
  func.func @transform_0(%arg0: i32, %arg1: i32) -> (i32, i32) {
    %c1_i32 = arith.constant 1 : i32
    %0 = arith.muli %arg0, %c1_i32 : i32
    %1 = arith.addi %0, %arg1 : i32
    %c0_i32 = arith.constant 0 : i32
    %c0_i32_0 = arith.constant 0 : i32
    return %1, %c0_i32 : i32, i32
  }
  func.func @transform_1(%arg0: i32, %arg1: i32) -> (i32, i32) {
    %c1_i32 = arith.constant 1 : i32
    %0 = arith.muli %arg0, %c1_i32 : i32
    %1 = arith.addi %0, %arg1 : i32
    %c0_i32 = arith.constant 0 : i32
    %c0_i32_0 = arith.constant 0 : i32
    return %1, %c0_i32 : i32, i32
  }
  func.func @transform_2(%arg0: i32, %arg1: i32) -> (i32, i32) {
    %c1_i32 = arith.constant 1 : i32
    %0 = arith.muli %arg0, %c1_i32 : i32
    %1 = arith.addi %0, %arg1 : i32
    %c0_i32 = arith.constant 0 : i32
    %c0_i32_0 = arith.constant 0 : i32
    return %1, %c0_i32 : i32, i32
  }
  func.func @transform_3(%arg0: i32, %arg1: i32) -> (i32, i32) {
    %c1_i32 = arith.constant 1 : i32
    %0 = arith.muli %arg0, %c1_i32 : i32
    %1 = arith.addi %0, %arg1 : i32
    %c0_i32 = arith.constant 0 : i32
    %c0_i32_0 = arith.constant 0 : i32
    return %1, %c0_i32 : i32, i32
  }
  func.func @transform_4(%arg0: i32, %arg1: i32) -> (i32, i32) {
    %c0_i32 = arith.constant 0 : i32
    %c0_i32_0 = arith.constant 0 : i32
    return %arg0, %c0_i32 : i32, i32
  }
}

</mosaic_0001>

<bundles_post_ra>
// kernel: tpu_custom_call.1
= control target key start
LH: loop header
LB: loop body
LE: loop exit
PB: predicated region body
PF: predicated region fallthrough
CT: control target
= control target key end

     0   :  { %9 = vsyncpa [#allocation5], 0  ;;  %s336_s0 = inlined_call_operand.hbm [shape: f32[8,128], index: 0, kind: input, shape index: {}]   ;;  %s337_s1 = inlined_call_operand.hbm [shape: f32[8,128], index: 1, kind: input, shape index: {}]   ;;  %s338_s2 = inlined_call_operand.hbm [shape: f32[8,128], index: 2, kind: input, shape index: {}]   ;;  %s339_s3 = inlined_call_operand.vmem [shape: f32[8,128], index: 3, kind: input, shape index: {}]   ;;  %s340_s4 = inlined_call_operand.hbm [shape: f32[8,128], index: 4, kind: output, shape index: {}]  }
   0x1   :  { %10 = vsyncpa [#allocation8], 0 }
   0x2   :  { %11 = vsyncpa [#allocation6], 0  ;;  %s256_s15 = smov [#allocation7]   ;;  %s257_s17 = smov [#allocation4]  }
   0x3   :  { %s34_s16 = sshll.u32 %s256_s15, 4  ;;  %s21_s18 = sshll.u32 %s257_s17, 4  ;;  %s35_s16 = int_to_ptr.vmem [resolvable:$true] %s34_s16  ;;  %s22_s18 = int_to_ptr.vmem [resolvable:$true] %s21_s18 }
   0x4   :  { %s162_s21 = scalar_lea.hbm %s337_s1, 128 }
   0x5   :  { %p163_p0 = scmp.ne.s32.totalorder %s337_s1, %s162_s21  ;;  %p166_p1 = scmp.lt.u32.totalorder %s162_s21, %s337_s1 }
   0x7   :  { %p168_p2 = pnand %p166_p1, %p163_p0 }
   0x9   :  { %171 = shalt.err (!%p168_p2)
}
   0xa   :  { %s172_s26 = scalar_lea.vmem %s35_s16, 128  ;;  %p177_p4 = scmp.lt.s32.totalorder %s35_s16, %s35_s16 }
   0xb   :  { %p173_p3 = scmp.ne.s32.totalorder %s35_s16, %s172_s26  ;;  %p178_p5 = scmp.lt.s32.totalorder %s172_s26, %s172_s26 }
   0xd   :  { %p179_p6 = por %p178_p5, %p177_p4 }
   0xf   :  { %p180_p7 = pnand %p179_p6, %p173_p3 }
  0x11   :  { %183 = shalt.err (!%p180_p7)
}
  0x12   :  { %37 = dma.hbm_to_vmem [thread:$0]  %s337_s1, 128, %s35_s16, [#allocation8]  }
  0x13   :  { %s184_s5 = scalar_lea.hbm %s336_s0, 128 }
  0x14   :  { %p185_p8 = scmp.ne.s32.totalorder %s336_s0, %s184_s5  ;;  %p188_p9 = scmp.lt.u32.totalorder %s184_s5, %s336_s0 }
  0x16   :  { %p190_p10 = pnand %p188_p9, %p185_p8 }
  0x18   :  { %193 = shalt.err (!%p190_p10)
}
  0x19   :  { %s194_s10 = scalar_lea.vmem %s22_s18, 128  ;;  %p199_p12 = scmp.lt.s32.totalorder %s22_s18, %s22_s18 }
  0x1a   :  { %p195_p11 = scmp.ne.s32.totalorder %s22_s18, %s194_s10  ;;  %p200_p13 = scmp.lt.s32.totalorder %s194_s10, %s194_s10 }
  0x1c   :  { %p201_p0 = por %p200_p13, %p199_p12 }
  0x1e   :  { %p202_p1 = pnand %p201_p0, %p195_p11 }
  0x20   :  { %205 = shalt.err (!%p202_p1)
}
  0x21   :  { %24 = dma.hbm_to_vmem [thread:$0]  %s336_s0, 128, %s22_s18, [#allocation5]  }
  0x22   :  { %s258_s12 = smov [#allocation9]   ;;  %s206_s16 = scalar_lea.hbm %s338_s2, 128 }
  0x23   :  { %s47_s13 = sshll.u32 %s258_s12, 4  ;;  %p207_p2 = scmp.ne.s32.totalorder %s338_s2, %s206_s16  ;;  %s48_s13 = int_to_ptr.vmem [resolvable:$true] %s47_s13 }
  0x24   :  { %p210_p3 = scmp.lt.u32.totalorder %s206_s16, %s338_s2 }
  0x26   :  { %p212_p4 = pnand %p210_p3, %p207_p2 }
  0x28   :  { %215 = shalt.err (!%p212_p4)
}
  0x29   :  { %s216_s22 = scalar_lea.vmem %s48_s13, 128  ;;  %p221_p6 = scmp.lt.s32.totalorder %s48_s13, %s48_s13 }
  0x2a   :  { %p217_p5 = scmp.ne.s32.totalorder %s48_s13, %s216_s22  ;;  %p222_p7 = scmp.lt.s32.totalorder %s216_s22, %s216_s22 }
  0x2c   :  { %p223_p8 = por %p222_p7, %p221_p6 }
  0x2e   :  { %p224_p9 = pnand %p223_p8, %p217_p5 }
  0x30   :  { %227 = shalt.err (!%p224_p9)
}
  0x31   :  { %50 = dma.hbm_to_vmem [thread:$0]  %s338_s2, 128, %s48_s13, [#allocation8]  }
  0x32   :  { %250 = dma.done.wait [#allocation5], 128  }
  0x33   :  { %251 = vsyncadd [#allocation5], 4294967168 }
  0x34   :  { %252 = dma.done.wait [#allocation8], 256  }
  0x35   :  { %253 = vsyncadd [#allocation8], 4294967040  ;;  %v88_v0 = vld [vmem:[#allocation4] sm:$0xff]  ;;  %v89_v1 = vld [vmem:[#allocation7] sm:$0xff]  ;;  %s259_s27 = smov [#allocation10]  }
  0x36   :  { %v95_v2 = vld [vmem:[#allocation9] sm:$0xff]  ;;  %v90_v3 = vsub.f32 %v88_v0, %v89_v1  ;;  %v96_v5 = vld [vmem:[%s339_s3] sm:$0xff]  ;;  %s138_s28 = sshll.u32 %s259_s27, 4  ;;  %s139_s28 = int_to_ptr.vmem [resolvable:$true] %s138_s28 }
  0x37   :  { %v97_v4 = vmul.f32 %v95_v2, %v95_v2  ;;  %s228_s30 = scalar_lea.vmem %s139_s28, 128  ;;  %p233_p11 = scmp.lt.s32.totalorder %s139_s28, %s139_s28 }
  0x38   :  { %v92_v6 = vmul.f32 %v90_v3, %v90_v3  ;;  %p229_p10 = scmp.ne.s32.totalorder %s139_s28, %s228_s30  ;;  %p234_p12 = scmp.lt.s32.totalorder %s228_s30, %s228_s30 }
  0x39   :  { %v98_v7 = vmul.f32 0.0625, %v97_v4 }
  0x3a   :  { %108 = vadd.xlane.f32.xlu0 %v92_v6  ;;  %p235_p13 = por %p234_p12, %p233_p11 }
  0x3b   :  { %v99_v8 = vsub.f32 %v98_v7, %v96_v5 }
  0x3c   :  { %p236_p0 = pnand %p235_p13, %p229_p10 }
  0x3d   :  { %v101_v9 = vmul.f32 %v99_v8, %v99_v8 }
  0x3f   :  { %119 = vadd.xlane.f32.xlu0 %v101_v9 }
  0xc7   :  { %v109_v10 = vpop.xlane.xlu0 %108 }
  0xc8   :  { %v110_v11 = vrot.slane %v109_v10, 4 }
  0xca   :  { %v111_v12 = vadd.f32 %v110_v11, %v109_v10 }
  0xcc   :  { %v120_v13 = vpop.xlane.xlu0 %119  ;;  %v112_v14 = vrot.slane %v111_v12, 2 }
  0xcd   :  { %v121_v15 = vrot.slane %v120_v13, 4 }
  0xce   :  { %v113_v17 = vadd.f32 %v112_v14, %v111_v12 }
  0xcf   :  { %v122_v16 = vadd.f32 %v121_v15, %v120_v13 }
  0xd0   :  { %v114_v19 = vrot.slane %v113_v17, 1 }
  0xd1   :  { %v123_v18 = vrot.slane %v122_v16, 2 }
  0xd2   :  { %v115_v21 = vadd.f32 %v114_v19, %v113_v17 }
  0xd3   :  { %v124_v20 = vadd.f32 %v123_v18, %v122_v16 }
  0xd4   :  { %154 = vpush %v115_v21 }
  0xd5   :  { %v125_v22 = vrot.slane %v124_v20, 1 }
  0xd7   :  { %v126_v23 = vadd.f32 %v125_v22, %v124_v20 }
  0xd9   :  { %156 = vpush %v126_v23 }
 0x105   :  { %s155_s2 = spop %154 }
 0x106   :  { %s117_s3 = smul.f32 0.125, %s155_s2 }
 0x10a   :  { %s157_s25 = spop %156 }
 0x10b   :  { %s128_s26 = smul.f32 0.05, %s157_s25 }
 0x10d   :  { %s129_s29 = sadd.f32 %s128_s26, %s117_s3 }
 0x10f   :  { %v130_v24 = vstv %s129_s29 }
 0x110   :  { %131 = vst [vmem:[#allocation10] sm:$0xff] %v130_v24 }
 0x111   :  { %239 = shalt.err (!%p236_p0)
}
 0x112   :  { %s240_s7 = scalar_lea.hbm %s340_s4, 128 }
 0x113   :  { %p241_p1 = scmp.ne.s32.totalorder %s340_s4, %s240_s7  ;;  %p244_p2 = scmp.lt.u32.totalorder %s240_s7, %s340_s4 }
 0x115   :  { %p246_p3 = pnand %p244_p2, %p241_p1 }
 0x117   :  { %249 = shalt.err (!%p246_p3)
}
 0x118   :  { %141 = dma.vmem_to_hbm [thread:$0]  %s139_s28, 128, %s340_s4, [#allocation6]  }
 0x119   :  { %254 = dma.done.wait [#allocation6], 128  }
 0x11a   :  { %255 = vsyncadd [#allocation6], 4294967168 }
 0x11b   :  { %145 = vsyncpa [#allocation5], 1 }
 0x11c   :  { %146 = vsyncpa [#allocation8], 1 }
 0x11d   :  { %147 = vsyncpa [#allocation6], 1 }

</bundles_post_ra>
